<compile_context>
chip_gen: v6e
topology: v6e:2x2x1
jax: 0.10.0
libtpu: 0.0.40
codegen_flags: <defaults>
</compile_context>

<pallas_src>
import functools

import jax
import jax.numpy as jnp
from jax.experimental import pallas as pl
from jax.experimental.pallas import tpu as pltpu


def _round_up(x: int, m: int) -> int:
    return ((x + m - 1) // m) * m


def _cdiv(a: int, b: int) -> int:
    return (a + b - 1) // b


@functools.lru_cache(maxsize=1)
def _tpu_vmem_bytes() -> int:
    """Per-core VMEM capacity; conservative 64 MiB (v7x) fallback if the query fails."""
    try:
        info = pltpu.get_tpu_info()
        return int(getattr(info, "vmem_capacity_bytes", 64 * 1024 * 1024))
    except Exception:  # older jax / non-TPU tracing environment
        return 64 * 1024 * 1024


def _pick_tile(bp_rows: int, kp: int, vmem_cap: int) -> int:
    """Packed-row tile: biggest multiple of 8 whose double-buffered blocks fit the budget."""
    bytes_per_row = 4 * (max(kp, 128) + 128)   # f32 input lanes + output lanes (both pad to 128)
    budget = min(int(vmem_cap * 0.55), 80 * 1024 * 1024)
    t = max(8, (budget // (2 * bytes_per_row)) // 8 * 8)
    # Megacore (v7x): make sure large batches span >= 2 grid steps so ("parallel",)
    # can shard across both TensorCores; negligible extra cost on 1-TC parts.
    if bp_rows >= 1024:
        t = min(t, max(8, _round_up(_cdiv(bp_rows, 2), 8)))
    return min(t, _round_up(bp_rows, 8))


def bpred_kernel(w_ref, b_ref, x_ref, o_ref):
    """w_ref: VMEM (pack*D, 2*pack) f32 block-diagonal signed weight delta (resident)
       b_ref: VMEM (1, 2*pack)      f32 signed bias-delta row               (resident)
       x_ref: VMEM (tb, pack*D)         packed input rows (any float dtype)
       o_ref: VMEM (tb, 2*pack)     f32 interleaved log-probs; reshapes to (B, 2)."""
    x = x_ref[...].astype(jnp.float32)
    # MXU: s[:, 2j] = +d_j, s[:, 2j+1] = -d_j (d_j = logit delta of packed row j).
    s = jnp.dot(x, w_ref[...], preferred_element_type=jnp.float32) + b_ref[...]
    # log_softmax([z0, z1]) = [-softplus(d), -softplus(-d)]  =>  out = -softplus(s).
    # Numerically stable: -softplus(s) = min(-s, 0) - log(1 + exp(-|s|)).
    o_ref[...] = (jnp.minimum(-s, 0.0)
                  - jnp.log(1.0 + jnp.exp(-jnp.abs(s)))).astype(o_ref.dtype)


@functools.partial(jax.jit, static_argnames=("pack", "tb", "vmem_limit"))
def _bpred_forward_impl(data, weight, bias, *, pack, tb, vmem_limit):
    B, D = data.shape
    kp = pack * D
    b_pad = _round_up(B, pack)
    bp = b_pad // pack

    # Fold Linear(bhr_len, 2) + 2-class log-softmax into a signed block-diagonal
    # weight-delta matrix and a signed bias row (tiny XLA ops, once per call).
    wd = (weight[:, 1] - weight[:, 0]).astype(jnp.float32)             # (D,)
    bd = (bias[1] - bias[0]).astype(jnp.float32)                       # ()
    pm = jnp.stack([wd, -wd], axis=1)                                  # (D, 2)
    eye = jnp.eye(pack, dtype=jnp.float32)
    w_sig = (eye[:, None, :, None] * pm[None, :, None, :]).reshape(kp, 2 * pack)
    b_sig = (jnp.tile(jnp.array([1.0, -1.0], jnp.float32), pack) * bd).reshape(1, 2 * pack)

    x = data
    if b_pad != B:
        # Only when B % pack != 0 (<= pack-1 rows); multiples of `pack` are copy-free.
        x = jnp.pad(x, ((0, b_pad - B), (0, 0)))
    xp = x.reshape(bp, kp)                                             # free row-major reshape

    out = pl.pallas_call(
        bpred_kernel,
        out_shape=jax.ShapeDtypeStruct((bp, 2 * pack), jnp.float32),
        grid=(_cdiv(bp, tb),),                                         # last block clipped by Pallas
        in_specs=[
            pl.BlockSpec((kp, 2 * pack), lambda i: (0, 0)),            # weights: fetched once
            pl.BlockSpec((1, 2 * pack), lambda i: (0, 0)),             # bias row: fetched once
            pl.BlockSpec((tb, kp), lambda i: (i, 0)),                  # packed input: pipelined
            # TODO(synk): add pipeline_mode=pl.Buffered(3) on x if v7x profiling shows
            # inter-step DMA gaps once the kernel is HBM-bound.
        ],
        out_specs=pl.BlockSpec((tb, 2 * pack), lambda i: (i, 0)),
        compiler_params=pltpu.CompilerParams(
            dimension_semantics=("parallel",),                         # shard batch grid across TCs
            vmem_limit_bytes=vmem_limit,
        ),
    )(w_sig, b_sig, xp)

    out = out.reshape(b_pad, 2)                                        # (B_pad, 2) log-probs
    return out if b_pad == B else out[:B]


def bpred_forward(data, weight, bias, block_rows=None):
    """data: (B, bhr_len), weight: (bhr_len, 2), bias: (2,) -> (B, 2) log-probabilities.

    `block_rows` (optional) is the *packed*-row tile (each packed row = `pack` original
    rows); by default it is sized from the device's VMEM capacity."""
    B, D = data.shape
    pack = 128 // D if (D <= 128 and 128 % D == 0) else 1              # 4 rows / vreg row at D=32
    kp = pack * D
    bp = _round_up(B, pack) // pack

    vmem_cap = _tpu_vmem_bytes()
    tb = block_rows if block_rows is not None else _pick_tile(bp, kp, vmem_cap)
    tb = max(8, _round_up(min(tb, _round_up(bp, 8)), 8))

    bytes_per_row = 4 * (max(kp, 128) + 128)
    needed = 2 * tb * bytes_per_row + (2 << 20)
    vmem_limit = int(max(32 << 20, min(vmem_cap - (8 << 20), needed + (16 << 20))))

    return _bpred_forward_impl(data, weight, bias, pack=pack, tb=tb, vmem_limit=vmem_limit)


def init_params(key, bhr_len):
    """Deterministic init mimicking torch.nn.Linear defaults (uniform +/- 1/sqrt(fan_in))."""
    kw, kb = jax.random.split(key)
    bound = 1.0 / jnp.sqrt(float(bhr_len))
    weight = jax.random.uniform(kw, (bhr_len, 2), jnp.float32, -bound, bound)
    bias = jax.random.uniform(kb, (2,), jnp.float32, -bound, bound)
    return weight, bias


def _reference(data, weight, bias):
    logits = jnp.dot(data, weight, precision=jax.lax.Precision.HIGHEST) + bias
    return jax.nn.log_softmax(logits, axis=1)


if __name__ == "__main__":
    key = jax.random.PRNGKey(0)
    k_data, k_data2, k_params = jax.random.split(key, 3)

    bhr_len = 32                       # branch-history-register length (Linear fan-in)
    weight, bias = init_params(k_params, bhr_len)

    # Case 1: batch multiple of the pack factor (copy-free path), auto tile, 1 grid step
    # whose single block is larger than the packed array (exercises block clipping).
    data = jax.random.normal(k_data, (20, bhr_len), jnp.float32)
    out = jax.block_until_ready(bpred_forward(data, weight, bias))
    ref = _reference(data, weight, bias)
    assert out.shape == (20, 2)
    assert jnp.allclose(out, ref, atol=2e-5, rtol=1e-5), "auto-tiled kernel mismatch vs reference"

    # Case 2: batch not a multiple of 4 (<= 3-row pad) with an explicit small packed-row
    # tile -> multi-step grid whose last block is clipped by Pallas (no whole-tile pad).
    data2 = jax.random.normal(k_data2, (70, bhr_len), jnp.float32)
    out2 = jax.block_until_ready(bpred_forward(data2, weight, bias, block_rows=8))
    ref2 = _reference(data2, weight, bias)
    assert out2.shape == (70, 2)
    assert jnp.allclose(out2, ref2, atol=2e-5, rtol=1e-5), "tiled kernel mismatch vs reference"

    print("KERNEL_OK")
</pallas_src>

<mosaic_0001>
module attributes {stable_mosaic.version = 11 : i64} {
  func.func @bpred_kernel(%arg0: i32, %arg1: memref<128x8xf32, #tpu.memory_space<vmem>>, %arg2: memref<1x8xf32, #tpu.memory_space<vmem>>, %arg3: memref<8x128xf32, #tpu.memory_space<vmem>>, %arg4: memref<8x8xf32, #tpu.memory_space<vmem>>) attributes {dimension_semantics = [#tpu.dimension_semantics<parallel>], iteration_bounds = array<i64: 1>, scalar_prefetch = 0 : i64, scratch_operands = 0 : i64, tpu.core_type = #tpu.core_type<tc>, window_params = [{pipeline_mode = #tpu.pipeline_mode<synchronous>, transform_indices = @transform_0, window_bounds = array<i64: 128, 8>}, {pipeline_mode = #tpu.pipeline_mode<synchronous>, transform_indices = @transform_1, window_bounds = array<i64: 1, 8>}, {transform_indices = @transform_2, window_bounds = array<i64: 8, 128>}, {transform_indices = @transform_3, window_bounds = array<i64: 8, 8>}]} {
    %c0 = arith.constant 0 : index
    %c0_0 = arith.constant 0 : index
    %0 = vector.load %arg3[%c0, %c0_0] : memref<8x128xf32, #tpu.memory_space<vmem>>, vector<8x128xf32>
    %c0_1 = arith.constant 0 : index
    %c0_2 = arith.constant 0 : index
    %1 = vector.load %arg1[%c0_1, %c0_2] : memref<128x8xf32, #tpu.memory_space<vmem>>, vector<128x8xf32>
    %cst = arith.constant dense<0.000000e+00> : vector<8x8xf32>
    %2 = tpu.matmul %0, %1, %cst {dimension_numbers = #tpu.dot_dimension_numbers<[1], [0], [0], [1], [0, 0, 1, 1], [], []>} : vector<8x128xf32>, vector<128x8xf32>, vector<8x8xf32> -> vector<8x8xf32>
    %c0_3 = arith.constant 0 : index
    %c0_4 = arith.constant 0 : index
    %3 = vector.load %arg2[%c0_3, %c0_4] : memref<1x8xf32, #tpu.memory_space<vmem>>, vector<1x8xf32>
    %4 = vector.broadcast %3 : vector<1x8xf32> to vector<8x8xf32>
    %5 = arith.addf %2, %4 : vector<8x8xf32>
    %cst_5 = arith.constant 0.000000e+00 : f32
    %6 = vector.broadcast %cst_5 : f32 to vector<8x8xf32>
    %7 = arith.subf %6, %5 : vector<8x8xf32>
    %cst_6 = arith.constant 0.000000e+00 : f32
    %8 = vector.broadcast %cst_6 : f32 to vector<8x8xf32>
    %9 = arith.minimumf %7, %8 : vector<8x8xf32>
    %10 = math.absf %5 : vector<8x8xf32>
    %cst_7 = arith.constant 0.000000e+00 : f32
    %11 = vector.broadcast %cst_7 : f32 to vector<8x8xf32>
    %12 = arith.subf %11, %10 : vector<8x8xf32>
    %13 = math.exp %12 : vector<8x8xf32>
    %cst_8 = arith.constant 1.000000e+00 : f32
    %14 = vector.broadcast %cst_8 : f32 to vector<8x8xf32>
    %15 = arith.addf %14, %13 : vector<8x8xf32>
    %16 = math.log %15 : vector<8x8xf32>
    %17 = arith.subf %9, %16 : vector<8x8xf32>
    %c0_9 = arith.constant 0 : index
    %c0_10 = arith.constant 0 : index
    %18 = vector.load %arg4[%c0_9, %c0_10] : memref<8x8xf32, #tpu.memory_space<vmem>>, vector<8x8xf32>
    tpu.vector_store %arg4[%c0_9, %c0_10], %17 {strides = array<i32>} : memref<8x8xf32, #tpu.memory_space<vmem>>, vector<8x8xf32>,
    return
  }
  func.func @transform_0(%arg0: i32) -> (i32, i32) {
    %c0_i32 = arith.constant 0 : i32
    %c0_i32_0 = arith.constant 0 : i32
    %c0_i32_1 = arith.constant 0 : i32
    return %c0_i32, %c0_i32_0 : i32, i32
  }
  func.func @transform_1(%arg0: i32) -> (i32, i32) {
    %c0_i32 = arith.constant 0 : i32
    %c0_i32_0 = arith.constant 0 : i32
    %c0_i32_1 = arith.constant 0 : i32
    return %c0_i32, %c0_i32_0 : i32, i32
  }
  func.func @transform_2(%arg0: i32) -> (i32, i32) {
    %c0_i32 = arith.constant 0 : i32
    %c0_i32_0 = arith.constant 0 : i32
    return %arg0, %c0_i32 : i32, i32
  }
  func.func @transform_3(%arg0: i32) -> (i32, i32) {
    %c0_i32 = arith.constant 0 : i32
    %c0_i32_0 = arith.constant 0 : i32
    return %arg0, %c0_i32 : i32, i32
  }
}

</mosaic_0001>

<bundles_post_ra>
// kernel: _bpred_forward_impl.1
= control target key start
LH: loop header
LB: loop body
LE: loop exit
PB: predicated region body
PF: predicated region fallthrough
CT: control target
= control target key end

     0   :  { %v183_v0 = vmov 0.0   ;;  %vm184_vm0 = vmmov 0   ;;  %vm118_vm1 = vcmask 64512   ;;  %s262_s0 = inlined_call_operand.vmem [shape: f32[128,8], index: 0, kind: input, shape index: {}]   ;;  %s263_s2 = inlined_call_operand.vmem [shape: f32[5,128], index: 2, kind: input, shape index: {}]   ;;  %s264_s1 = inlined_call_operand.vmem [shape: f32[1,8], index: 1, kind: input, shape index: {}]   ;;  %s265_s3 = inlined_call_operand.vmem [shape: f32[5,8], index: 3, kind: output, shape index: {}]  }
   0x1   :  { %142 = vmatprep.subr.mxu0 %v183_v0  ;;  %v30_v1 = vld [vmem:[%s262_s0 + $0x78] sm:$0xff]  ;;  %v29_v2 = vld [vmem:[%s262_s0 + $0x70] sm:$0xff]  ;;  %174 = vmatprep.mubr.msk.f32.mxu0 %vm184_vm0, %v183_v0  ;;  %v28_v3 = vld [vmem:[%s262_s0 + $0x68] sm:$0xff] }
   0x2   :  { %143 = vmatpush3.msra.mxu0 %v30_v1  ;;  %v27_v4 = vld [vmem:[%s262_s0 + $0x60] sm:$0xff]  ;;  %v26_v5 = vld [vmem:[%s262_s0 + $0x58] sm:$0xff]  ;;  %v25_v6 = vld [vmem:[%s262_s0 + $0x50] sm:$0xff] }
   0x3   :  { %144 = vmatprep.subr.mxu0 %v183_v0  ;;  %v24_v7 = vld [vmem:[%s262_s0 + $0x48] sm:$0xff]  ;;  %v23_v8 = vld [vmem:[%s262_s0 + $0x40] sm:$0xff]  ;;  %v22_v9 = vld [vmem:[%s262_s0 + $0x38] sm:$0xff] }
   0x4   :  { %145 = vmatpush3.msra.mxu0 %v29_v2  ;;  %v21_v10 = vld [vmem:[%s262_s0 + $0x30] sm:$0xff]  ;;  %v20_v11 = vld [vmem:[%s262_s0 + $0x28] sm:$0xff]  ;;  %v19_v12 = vld [vmem:[%s262_s0 + $0x20] sm:$0xff] }
   0x5   :  { %146 = vmatprep.subr.mxu0 %v183_v0  ;;  %v18_v13 = vld [vmem:[%s262_s0 + $0x18] sm:$0xff]  ;;  %v17_v14 = vld [vmem:[%s262_s0 + $0x10] sm:$0xff]  ;;  %v16_v15 = vld [vmem:[%s262_s0 + $0x8] sm:$0xff] }
   0x6   :  { %147 = vmatpush3.msra.mxu0 %v28_v3  ;;  %v15_v16 = vld [vmem:[%s262_s0] sm:$0xff] }
   0x7   :  { %148 = vmatprep.subr.mxu0 %v183_v0  ;;  %v14_v17 = vld [vmem:[%s263_s2] sm:$0xff] }
   0x8   :  { %149 = vmatpush3.msra.mxu0 %v27_v4  ;;  %v124_v18 = vld [vmem:[%s264_s1] ss:$0 sm:$0xff] }
   0x9   :  { %150 = vmatprep.subr.mxu0 %v183_v0 }
   0xa   :  { %151 = vmatpush3.msra.mxu0 %v26_v5 }
   0xb   :  { %152 = vmatprep.subr.mxu0 %v183_v0 }
   0xc   :  { %153 = vmatpush3.msra.mxu0 %v25_v6 }
   0xd   :  { %154 = vmatprep.subr.mxu0 %v183_v0 }
   0xe   :  { %155 = vmatpush3.msra.mxu0 %v24_v7 }
   0xf   :  { %156 = vmatprep.subr.mxu0 %v183_v0 }
  0x10   :  { %157 = vmatpush3.msra.mxu0 %v23_v8 }
  0x11   :  { %158 = vmatprep.subr.mxu0 %v183_v0 }
  0x12   :  { %159 = vmatpush3.msra.mxu0 %v22_v9 }
  0x13   :  { %160 = vmatprep.subr.mxu0 %v183_v0 }
  0x14   :  { %161 = vmatpush3.msra.mxu0 %v21_v10 }
  0x15   :  { %162 = vmatprep.subr.mxu0 %v183_v0 }
  0x16   :  { %163 = vmatpush3.msra.mxu0 %v20_v11 }
  0x17   :  { %164 = vmatprep.subr.mxu0 %v183_v0 }
  0x18   :  { %165 = vmatpush3.msra.mxu0 %v19_v12 }
  0x19   :  { %166 = vmatprep.subr.mxu0 %v183_v0 }
  0x1a   :  { %167 = vmatpush3.msra.mxu0 %v18_v13 }
  0x1b   :  { %168 = vmatprep.subr.mxu0 %v183_v0 }
  0x1c   :  { %169 = vmatpush3.msra.mxu0 %v17_v14 }
  0x1d   :  { %170 = vmatprep.subr.mxu0 %v183_v0 }
  0x1e   :  { %171 = vmatpush3.msra.mxu0 %v16_v15 }
  0x1f   :  { %172 = vmatprep.subr.mxu0 %v183_v0 }
  0x20   :  { %173 = vmatpush3.msra.mxu0 %v15_v16 }
  0x21   :  { %175 = vmatmul.mubr.f32.vlgmr.msra.gmra.mxu0 %v14_v17 }
  0xe1   :  { %v104_v19 = vpop.f32.mrf.mxu0 }
  0xe2   :  { %v105_v20 = vadd.f32 %v124_v18, %v104_v19 }
  0xe3   :  { %v176_v21 = vpop.f32.mrf.mxu0 }
  0xe4   :  { %v110_v22 = vand.u32 2147483647, %v105_v20  ;;  %v108_v27 = vsub.f32 0.0, %v105_v20 }
  0xe6   :  { %v111_v23 = vsub.f32 0.0, %v110_v22  ;;  %v109_v29 = vmin.f32 %v108_v27, 0.0 }
  0xe8   :  { %v112_v24 = vmul.f32 1.442695, %v111_v23 }
  0xea   :  { %179 = vpow2.f32 %v112_v24 }
  0xf7   :  { %v180_v25 = vpop.eup %179 }
  0xf8   :  { %v114_v26 = vadd.f32 1.0, %v180_v25 }
  0xfa   :  { %181 = vlog2.f32 %v114_v26 }
 0x107   :  { %v182_v28 = vpop.eup %181 }
 0x108   :  { %v116_v30 = vmul.f32 0.6931472, %v182_v28 }
 0x10a   :  { %v117_v31 = vsub.f32 %v109_v29, %v116_v30 }
 0x10c   :  { %119 = vst.msk [vmem:[%s265_s3] sm:$0xff] %vm118_vm1, %v117_v31 }

</bundles_post_ra>
